<compile_context>
chip_gen: v6e
topology: v6e:2x2x1
jax: 0.10.0
libtpu: 0.0.40
codegen_flags: <defaults>
</compile_context>

<pallas_src>
import functools

import jax
import jax.numpy as jnp
from jax.experimental import pallas as pl
from jax.experimental.pallas import tpu as pltpu


def _rmsnorm_kernel(x_ref, w_ref, o_ref, *, eps: float, inv_d: float):
    # x_ref: (tile_rows, d_pad) block in VMEM
    # w_ref: (1, d_pad) weight block (same block every grid step -> resident,
    #        no per-step DMA)
    # Sum of squares over the feature (lane) axis in f32; 1/d_model folded in
    # as a compile-time constant (avoids a full-width divide on the VALU).
    xf = x_ref[...].astype(jnp.float32)
    ms = jnp.sum(xf * xf, axis=-1, keepdims=True) * inv_d      # (tile_rows, 1)
    inv = jax.lax.rsqrt(ms + eps)                               # EUP slot
    w = w_ref[...].astype(jnp.float32)                          # (1, d_pad)
    # Re-read x from VMEM for the scale path instead of reusing `xf`: a
    # multi-MiB f32 copy of the tile cannot stay in 64 vregs across the XLU
    # reduction and would spill to a VMEM temp (an extra full write+read pass
    # over the tile).  Ref loads are stateful and are not CSE'd.
    o_ref[...] = (x_ref[...].astype(jnp.float32) * inv * w).astype(o_ref.dtype)


def _sublane_multiple(dtype) -> int:
    # Rows per packed vreg sublane group for this dtype.
    return {4: 8, 2: 16, 1: 32}.get(jnp.dtype(dtype).itemsize, 8)


def _vmem_capacity_bytes() -> int:
    """Physical VMEM per core; conservative 64 MiB (v7x) fallback."""
    try:
        cap = getattr(pltpu.get_tpu_info(), "vmem_capacity_bytes", None)
        if cap:
            return int(cap)
    except Exception:
        pass
    return 64 * 1024 * 1024


def _pick_tile_rows(rows: int, d_pad: int, dtype, block_budget: int) -> int:
    """Byte-targeted, sublane-aligned row tile.

    Targets ~8 MiB per input block (measured 4-16 MiB streaming sweet spot),
    bounded by the generation-aware VMEM block budget and by a >=4-block grid
    cap so the "parallel" grid axis shards across both v7x TensorCores.
    """
    sub = _sublane_multiple(dtype)
    isz = jnp.dtype(dtype).itemsize
    if rows < sub:
        # Block dim equals the full (tiny) array dim -> allowed by Mosaic.
        return max(rows, 1)

    row_in = d_pad * isz
    # (a) ~8 MiB per input block.
    target_in_block = 8 * 1024 * 1024
    tile = max(sub, target_in_block // row_in)
    # (b) resident footprint: 2x in + 2x out double-buffered + 1x f32 temp.
    per_row_resident = 4 * row_in + d_pad * 4
    tile = min(tile, max(sub, block_budget // per_row_resident))
    # (c) guarantee >= 4 grid blocks when rows allow (megacore sharding on
    #     v7x + effective double buffering).
    cap4 = -(-rows // 4)                     # ceil(rows/4)
    cap4 = -(-cap4 // sub) * sub             # round up to sublane multiple
    tile = min(tile, max(cap4, sub))
    # (d) sublane alignment.
    tile = max(sub, (tile // sub) * sub)
    return int(tile)
    # TODO(synk): no feature-axis tiling fallback — for extremely wide d_model
    # a single (sub, d_model) block may still exceed the VMEM limit.


def rmsnorm(x: jax.Array, weight: jax.Array, eps: float = 1e-5,
            tile_rows: int | None = None) -> jax.Array:
    """RMSNorm over the last axis of x. x: (..., d_model), weight: (d_model,)."""
    orig_shape = x.shape
    d_model = orig_shape[-1]
    rows = 1
    for s in orig_shape[:-1]:
        rows *= s

    # Flattening leading dims is metadata-only (no HBM copy).
    x2 = x.reshape(rows, d_model)
    w2 = weight.reshape(1, d_model)

    # Lane-dense feature axis: pad to a multiple of 128 so the output spec
    # uses unmasked vst (padded zeros contribute 0 to the sum-of-squares and
    # the 1/d_model constant keeps the mean over the *original* width).
    d_pad = -(-d_model // 128) * 128
    if d_pad != d_model:
        x2 = jnp.pad(x2, ((0, 0), (0, d_pad - d_model)))
        w2 = jnp.pad(w2, ((0, 0), (0, d_pad - d_model)))

    # Generation-aware VMEM budget / clamp.
    vmem_cap = _vmem_capacity_bytes()
    if vmem_cap >= 128 * 1024 * 1024:        # v5e / v6e
        block_budget = 64 * 1024 * 1024
        vmem_clamp = 96 << 20
    else:                                     # v7x (64 MiB per TC) or unknown
        block_budget = 32 * 1024 * 1024
        vmem_clamp = 40 << 20

    if tile_rows is None:
        tile_rows = _pick_tile_rows(rows, d_pad, x.dtype, block_budget)

    # Non-divisible grids are fine: Pallas masks writes in the ragged last
    # block, so no host-side padding over the row axis is needed.
    grid = (pl.cdiv(rows, tile_rows),)

    isz = jnp.dtype(x.dtype).itemsize
    w_isz = jnp.dtype(weight.dtype).itemsize
    in_blk = tile_rows * d_pad * isz
    out_blk = in_blk                          # output has the input dtype
    f32_tmp = tile_rows * d_pad * 4           # reduction temp, counted once
    vmem_limit = (2 * in_blk + 2 * out_blk    # double-buffered blocks only
                  + f32_tmp
                  + 2 * d_pad * w_isz
                  + (2 << 20))                # slack
    vmem_limit = int(min(max(vmem_limit, 16 << 20), vmem_clamp))

    cost = pl.CostEstimate(
        flops=4 * rows * d_pad,
        transcendentals=rows,
        bytes_accessed=2 * rows * d_pad * isz + d_pad * w_isz,
    )

    kernel = functools.partial(_rmsnorm_kernel,
                               eps=float(eps),
                               inv_d=1.0 / float(d_model))

    out = pl.pallas_call(
        kernel,
        out_shape=jax.ShapeDtypeStruct((rows, d_pad), x.dtype),
        grid_spec=pltpu.PrefetchScalarGridSpec(
            num_scalar_prefetch=0,
            grid=grid,
            in_specs=[
                pl.BlockSpec((tile_rows, d_pad), lambda i: (i, 0)),
                pl.BlockSpec((1, d_pad), lambda i: (0, 0)),
            ],
            out_specs=pl.BlockSpec((tile_rows, d_pad), lambda i: (i, 0)),
        ),
        compiler_params=pltpu.CompilerParams(
            dimension_semantics=("parallel",),   # shards grid across TCs on v7x
            vmem_limit_bytes=vmem_limit,
        ),
        cost_estimate=cost,
    )(x2, w2)

    if d_pad != d_model:
        out = out[:, :d_model]
    return out.reshape(orig_shape)


def rmsnorm_reference(x, weight, eps=1e-5):
    xf = x.astype(jnp.float32)
    ms = jnp.mean(xf * xf, axis=-1, keepdims=True)
    return (xf * jax.lax.rsqrt(ms + eps) * weight.astype(jnp.float32)).astype(x.dtype)


if __name__ == "__main__":
    key = jax.random.PRNGKey(0)

    # Primary test: small shape, lane-dense feature dim (multiple of 128).
    batch, seq, d_model = 2, 8, 256
    x = jax.random.normal(key, (batch, seq, d_model), dtype=jnp.float32)
    weight = jnp.ones((d_model,), dtype=jnp.float32)  # matches torch.ones(d_model)

    out = jax.block_until_ready(rmsnorm(x, weight, eps=1e-5))
    ref = rmsnorm_reference(x, weight, eps=1e-5)
    assert out.shape == x.shape
    assert jnp.allclose(out, ref, atol=1e-5, rtol=1e-5), "f32 mismatch vs reference"

    # Ragged-rows test: rows (= 3*7 = 21) not divisible by the tile -> exercises
    # the cdiv grid / masked last block path.
    x_r = jax.random.normal(jax.random.PRNGKey(1), (3, 7, d_model), jnp.float32)
    w_r = jax.random.normal(jax.random.PRNGKey(2), (d_model,), jnp.float32)
    out_r = jax.block_until_ready(rmsnorm(x_r, w_r, eps=1e-5))
    ref_r = rmsnorm_reference(x_r, w_r, eps=1e-5)
    assert jnp.allclose(out_r, ref_r, atol=1e-5, rtol=1e-5), "ragged mismatch"

    # bf16 test: tile aligned to 16-row sublane packing, f32 reduction inside.
    x_b = jax.random.normal(jax.random.PRNGKey(3), (2, 8, d_model)).astype(jnp.bfloat16)
    out_b = jax.block_until_ready(rmsnorm(x_b, weight, eps=1e-5))
    ref_b = rmsnorm_reference(x_b, weight, eps=1e-5)
    assert out_b.dtype == jnp.bfloat16
    assert jnp.allclose(out_b.astype(jnp.float32), ref_b.astype(jnp.float32),
                        atol=2e-2, rtol=2e-2), "bf16 mismatch"

    # Odd-width test: d_model=200 exercises the lane-padding (pad to 256,
    # slice back) path while keeping the mean over the true width.
    x_o = jax.random.normal(jax.random.PRNGKey(4), (2, 5, 200), jnp.float32)
    w_o = jax.random.normal(jax.random.PRNGKey(5), (200,), jnp.float32)
    out_o = jax.block_until_ready(rmsnorm(x_o, w_o, eps=1e-5))
    ref_o = rmsnorm_reference(x_o, w_o, eps=1e-5)
    assert out_o.shape == x_o.shape
    assert jnp.allclose(out_o, ref_o, atol=1e-5, rtol=1e-5), "odd-width mismatch"

    print("KERNEL_OK")
</pallas_src>

<mosaic_0001>
module attributes {stable_mosaic.version = 11 : i64} {
  func.func @_rmsnorm_kernel(%arg0: i32, %arg1: memref<8x256xf32, #tpu.memory_space<vmem>>, %arg2: memref<1x256xf32, #tpu.memory_space<vmem>>, %arg3: memref<8x256xf32, #tpu.memory_space<vmem>>) attributes {dimension_semantics = [#tpu.dimension_semantics<parallel>], iteration_bounds = array<i64: 2>, scalar_prefetch = 0 : i64, scratch_operands = 0 : i64, tpu.core_type = #tpu.core_type<tc>, window_params = [{transform_indices = @transform_0, window_bounds = array<i64: 8, 256>}, {pipeline_mode = #tpu.pipeline_mode<synchronous>, transform_indices = @transform_1, window_bounds = array<i64: 1, 256>}, {transform_indices = @transform_2, window_bounds = array<i64: 8, 256>}]} {
    %c0 = arith.constant 0 : index
    %c0_0 = arith.constant 0 : index
    %0 = vector.load %arg1[%c0, %c0_0] : memref<8x256xf32, #tpu.memory_space<vmem>>, vector<8x256xf32>
    %1 = arith.mulf %0, %0 : vector<8x256xf32>
    %cst = arith.constant dense<0.000000e+00> : vector<8xf32>
    %2 = vector.multi_reduction <add>, %1, %cst [1] : vector<8x256xf32> to vector<8xf32>
    %3 = vector.shape_cast %2 : vector<8xf32> to vector<8x1xf32>
    %cst_1 = arith.constant 3.906250e-03 : f32
    %4 = vector.broadcast %cst_1 : f32 to vector<8x1xf32>
    %5 = arith.mulf %3, %4 : vector<8x1xf32>
    %cst_2 = arith.constant 9.99999974E-6 : f32
    %6 = vector.broadcast %cst_2 : f32 to vector<8x1xf32>
    %7 = arith.addf %5, %6 : vector<8x1xf32>
    %8 = math.rsqrt %7 : vector<8x1xf32>
    %c0_3 = arith.constant 0 : index
    %c0_4 = arith.constant 0 : index
    %9 = vector.load %arg2[%c0_3, %c0_4] : memref<1x256xf32, #tpu.memory_space<vmem>>, vector<1x256xf32>
    %c0_5 = arith.constant 0 : index
    %c0_6 = arith.constant 0 : index
    %10 = vector.load %arg1[%c0_5, %c0_6] : memref<8x256xf32, #tpu.memory_space<vmem>>, vector<8x256xf32>
    %11 = vector.broadcast %8 : vector<8x1xf32> to vector<8x256xf32>
    %12 = arith.mulf %10, %11 : vector<8x256xf32>
    %13 = vector.broadcast %9 : vector<1x256xf32> to vector<8x256xf32>
    %14 = arith.mulf %12, %13 : vector<8x256xf32>
    %c0_7 = arith.constant 0 : index
    %c0_8 = arith.constant 0 : index
    %15 = vector.load %arg3[%c0_7, %c0_8] : memref<8x256xf32, #tpu.memory_space<vmem>>, vector<8x256xf32>
    tpu.vector_store %arg3[%c0_7, %c0_8], %14 {strides = array<i32>} : memref<8x256xf32, #tpu.memory_space<vmem>>, vector<8x256xf32>,
    return
  }
  func.func @transform_0(%arg0: i32) -> (i32, i32) {
    %c0_i32 = arith.constant 0 : i32
    %c0_i32_0 = arith.constant 0 : i32
    return %arg0, %c0_i32 : i32, i32
  }
  func.func @transform_1(%arg0: i32) -> (i32, i32) {
    %c0_i32 = arith.constant 0 : i32
    %c0_i32_0 = arith.constant 0 : i32
    %c0_i32_1 = arith.constant 0 : i32
    return %c0_i32, %c0_i32_0 : i32, i32
  }
  func.func @transform_2(%arg0: i32) -> (i32, i32) {
    %c0_i32 = arith.constant 0 : i32
    %c0_i32_0 = arith.constant 0 : i32
    return %arg0, %c0_i32 : i32, i32
  }
}

</mosaic_0001>

<bundles_post_ra>
// kernel: tpu_custom_call.1
= control target key start
LH: loop header
LB: loop body
LE: loop exit
PB: predicated region body
PF: predicated region fallthrough
CT: control target
= control target key end

     0   :  { %7 = vsyncpa [#allocation3], 0  ;;  %s687_s0 = inlined_call_operand.hbm [shape: f32[16,256], index: 0, kind: input, shape index: {}]   ;;  %s688_s1 = inlined_call_operand.hbm [shape: f32[1,256], index: 1, kind: input, shape index: {}]   ;;  %s689_s2 = inlined_call_operand.hbm [shape: f32[16,256], index: 2, kind: output, shape index: {}]  }
   0x1   :  { %9 = vsyncpa [#allocation3 + $0x1], 0 }
   0x2   :  { %10 = vsyncpa [#allocation6], 0 }
   0x3   :  { %11 = vsyncpa [#allocation4], 0 }
   0x4   :  { %13 = vsyncpa [#allocation4 + $0x1], 0  ;;  %s515_s9 = smov 0   ;;  %s517_s10 = smov 0  }
   0x5   :  { %s519_s11 = smov 0   ;;  %s521_s12 = smov 0  }
   0x6 LB: > { %s536_s13 = sadd.s32 4294967295, %s495_s12   ;;  %s296_s14 = sadd.s32 4294967294, %s495_s12   ;;  %s495_s12 = sphi %s521_s12, %s712_s12   ;;  %s491_s11 = sphi %s519_s11, %s711_s11   ;;  %s487_s10 = sphi %s517_s10, %s710_s10   ;;  %s483_s9 = sphi %s515_s9, %s709_s9  }
   0x7   : > { %p39_p0 = scmp.ne.s32.totalorder %s487_s10, %s483_s9  ;;  %p690_p1 = scmp.eq.s32.totalorder %s536_s13, 0 }
   0x8   : > { %p90_p3 = scmp.eq.s32.totalorder %s296_s14, 1  ;;  %p297_p5 = scmp.ge.s32.totalorder %s495_s12, 1 }
   0x9   : > { %p545_p4 = por %p690_p1, %p39_p0  ;;  %p97_p7 = scmp.lt.s32.totalorder %s495_s12, 3 }
   0xa   : > { %p550_p6 = por %p90_p3, %p39_p0  ;;  %s497_s18 = smov [#allocation5]  }
   0xb   : > { %s694_s15 = scalar_select %p545_p4, 1, 0 }
   0xc   : > { %s695_s16 = scalar_select %p550_p6, 1, 0 }
   0xd   : > { %p555_p8 = pnand %p297_p5, %p97_p7  ;;  %s110_s19 = sshll.u32 %s497_s18, 4  ;;  %s111_s19 = int_to_ptr.vmem [resolvable:$true] %s110_s19 }
   0xe   : > { %s563_s20 = sadd.s32 1, %s495_s12   ;;  %s26_s24 = sadd.s32 1, %s491_s11 }
   0xf   : > { %s696_s17 = scalar_select %p555_p8, 1, 0 }
  0x10   : > { %p322_p10 = pneg %p555_p8  ;;  %s23_s22 = ssub.s32 %s495_s12, %s563_s20 }
  0x11   : > { %p573_p12 = scmp.eq.s32.totalorder %s23_s22, 0  ;;  %p33_p13 = scmp.ne.s32.totalorder %s491_s11, %s487_s10 }
  0x12   : > { %p567_p11 = pnand %p322_p10, %p690_p1  ;;  %s384_s25 = scalar_lea.vmem %s111_s19, 32 }
  0x13   : > { %p385_p3 = scmp.ne.s32.totalorder %s111_s19, %s384_s25  ;;  %p392_p9 = scmp.lt.s32.totalorder %s111_s19, %s111_s19 }
  0x14   : > { %p375_p0 = pneg %p567_p11  ;;  %p393_p2 = scmp.lt.s32.totalorder %s384_s25, %s384_s25 }
  0x16   : > { %p387_p5 = pnand %p385_p3, %p375_p0  ;;  %p394_p10 = por %p393_p2, %p392_p9 }
  0x18   : > { %p388_p7 = pneg %p387_p5 }
  0x1a   : > { %p395_p1 = pnand %p394_p10, %p388_p7 }
  0x1c   : > { %398 = shalt.err (!%p395_p1)
}
  0x1d   : > { %325 = dma.hbm_to_vmem [thread:$0]  (!%p567_p11), %s688_s1, 32, %s111_s19, [#allocation6]  }
  0x1e   : > { %s590_s28 = scalar_select %p573_p12, %s491_s11, %s26_s24  }
  0x1f   : > { %p34_p1 = scmp.eq.s32.totalorder %s495_s12, 0  ;;  %p699_p2 = scmp.eq.s32.totalorder %s536_s13, 1 }
  0x20   : > { %p335_p0 = scmp.lt.s32.totalorder %s495_s12, 2  ;;  %s121_s30 = sand.u32 1, %s491_s11  }
  0x21   : > { %p598_p9 = por %p699_p2, %p33_p13  ;;  %p35_p3 = por %p34_p1, %p33_p13 }
  0x22   : > { %s300_s3 = sshll.u32 %s121_s30, 4  ;;  %s312_s4 = sshll.u32 %s495_s12, 8 }
  0x23   : > { %s700_s29 = scalar_select %p598_p9, 1, 0 }
  0x24   : > { %s611_s7 = scalar_lea.hbm %s687_s0, %s312_s4  ;;  %s125_s8 = scalar_lea.vmem [#allocation2], %s300_s3 }
  0x25   : > { %s133_s14 = sshll.u32 %s125_s8, 4  ;;  %p613_p11 = pnand %p335_p0, %p35_p3  ;;  %s134_s14 = int_to_ptr.vmem [resolvable:$true] %s133_s14 }
  0x26   : > { %s122_s19 = scalar_lea.sflag [#allocation3], %s121_s30  ;;  %s399_s21 = scalar_lea.hbm %s611_s7, 256 }
  0x27   : > { %p400_p12 = scmp.ne.s32.totalorder %s611_s7, %s399_s21  ;;  %p401_p13 = pneg %p613_p11 }
  0x28   : > { %s404_s24 = scalar_lea.hbm %s687_s0, 512  ;;  %p405_p10 = scmp.lt.s32.totalorder %s611_s7, %s687_s0 }
  0x29   : > { %p402_p5 = pnand %p401_p13, %p400_p12  ;;  %p406_p1 = scmp.lt.s32.totalorder %s404_s24, %s399_s21 }
  0x2b   : > { %p403_p7 = pneg %p402_p5  ;;  %p407_p2 = por %p406_p1, %p405_p10 }
  0x2d   : > { %p408_p0 = pnand %p407_p2, %p403_p7 }
  0x2f   : > { %411 = shalt.err (!%p408_p0)
}
  0x30   : > { %s412_s27 = scalar_lea.vmem %s134_s14, 256  ;;  %s498_s30 = smov [#allocation2]  }
  0x31   : > { %p413_p3 = scmp.ne.s32.totalorder %s134_s14, %s412_s27  ;;  %s417_s3 = sshll.u32 %s498_s30, 4  ;;  %s418_s3 = int_to_ptr.vmem [resolvable:$false] %s417_s3 }
  0x32   : > { %s419_s4 = scalar_lea.vmem %s418_s3, 512  ;;  %p420_p12 = scmp.lt.s32.totalorder %s134_s14, %s418_s3 }
  0x33   : > { %p415_p6 = pnand %p413_p3, %p401_p13  ;;  %p421_p5 = scmp.lt.s32.totalorder %s419_s4, %s412_s27 }
  0x35   : > { %p416_p9 = pneg %p415_p6  ;;  %p422_p4 = por %p421_p5, %p420_p12 }
  0x37   : > { %p423_p8 = pnand %p422_p4, %p416_p9 }
  0x39   : > { %426 = shalt.err (!%p423_p8)
}
  0x3a   : > { %329 = dma.hbm_to_vmem [thread:$0]  (!%p613_p11), %s611_s7, 256, %s134_s14, %s122_s19  }
  0x3b   : > { %p702_p7 = scmp.ne.s32.totalorder %s696_s17, 0 }
  0x3c   : > { %s634_s5 = sand.u32 (!%p702_p7), 1, %s487_s10   ;;  %p703_p6 = scmp.ne.s32.totalorder (!%p702_p7), %s694_s15, 0 }
  0x3d   : > { %142 = sbr.rel (%p702_p7) target bundleno = 248 (0xf8), region = 28  ;;  %s304_s6 = sshll.u32 (!%p702_p7), %s634_s5, 4 }
  0x3e   : > { %s145_s8 = scalar_lea.sflag (!%p702_p7), [#allocation3], %s634_s5  ;;  %s148_s21 = scalar_lea.vmem (!%p702_p7), [#allocation2], %s304_s6 }
  0x42   : > { %470 = dma.done.wait (%p703_p6), %s145_s8, 256  }
  0x43   : > { %472 = vsyncadd (%p703_p6), %s145_s8, 4294967040  ;;  %p704_p4 = scmp.eq.s32.totalorder %s536_s13, 0 }
  0x45   : > { %474 = dma.done.wait (%p704_p4), [#allocation6], 32   ;;  %p705_p8 = pmov %p704_p4 }
  0x46   : > { %v173_v0 = vld [vmem:[%s148_s21] sm:$0xff]  ;;  %v174_v1 = vld [vmem:[%s148_s21 + $0x8] sm:$0xff]  ;;  %v187_v8 = vlaneseq  ;;  %s313_s15 = sshll.u32 %s536_s13, 8  ;;  %s172_s17 = scalar_lea.vmem [#allocation7], %s304_s6 }
  0x47   : > { %476 = vsyncadd (%p705_p8), [#allocation6], 4294967264  ;;  %v175_v2 = vmul.f32 %v173_v0, %v173_v0  ;;  %v176_v3 = vmul.f32 %v174_v1, %v174_v1  ;;  %v183_v12 = vld [vmem:[#allocation5] sm:$0x3]  ;;  %s216_s7 = sshll.u32 %s172_s17, 4  ;;  %s650_s19 = scalar_lea.hbm %s689_s2, %s313_s15  ;;  %s217_s7 = int_to_ptr.vmem [resolvable:$true] %s216_s7 }
  0x48   : > { %v188_v9 = vshrl.u32 %v187_v8, 7  ;;  %s202_s22 = scalar_lea.sflag [#allocation4], %s634_s5  ;;  %s427_s23 = scalar_lea.vmem %s217_s7, 256 }
  0x49   : > { %v177_v4 = vadd.f32 %v176_v3, %v175_v2  ;;  %p428_p9 = scmp.ne.s32.totalorder %s217_s7, %s427_s23  ;;  %p706_p11 = scmp.ne.s32.totalorder %s700_s29, 0 }
  0x4a   : > { %v189_v10 = vsub.s32 0, %v188_v9  ;;  %v193_v11 = vsub.s32 1, %v188_v9  ;;  %s499_s13 = smov [#allocation7]  }
  0x4b   : > { %178 = vadd.xlane.f32.xlu0 %v177_v4  ;;  %p429_p13 = pnand %p428_p9, %p706_p11  ;;  %s431_s24 = sshll.u32 %s499_s13, 4  ;;  %s432_s24 = int_to_ptr.vmem [resolvable:$false] %s431_s24 }
  0x4c   : > { %v190_v13 = vrot.slane %v183_v12, %v189_v10  ;;  %v194_v14 = vrot.slane %v183_v12, %v193_v11  ;;  %s433_s25 = scalar_lea.vmem %s432_s24, 512  ;;  %p434_p1 = scmp.lt.s32.totalorder %s217_s7, %s432_s24 }
  0x4d   : > { %p430_p10 = pneg %p429_p13  ;;  %p435_p2 = scmp.lt.s32.totalorder %s433_s25, %s427_s23 }
  0x4f   : > { %p436_p0 = por %p435_p2, %p434_p1 }
  0x51   : > { %p437_p3 = pnand %p436_p0, %p430_p10 }
  0xd4   : > { %v179_v5 = vpop.xlane.xlu0 %178 }
  0xd5   : > { %v180_v6 = vmul.f32 0.00390625, %v179_v5 }
  0xd7   : > { %v181_v7 = vadd.f32 1e-05, %v180_v6 }
  0xd9   : > { %371 = vrsqrt.f32 %v181_v7 }
  0xe6   : > { %v372_v15 = vpop.eup %371 }
  0xe7   : > { %v184_v16 = vmul.f32 %v372_v15, %v173_v0  ;;  %v185_v17 = vmul.f32 %v372_v15, %v174_v1 }
  0xe9   : > { %v197_v18 = vmul.f32 %v190_v13, %v184_v16  ;;  %v198_v19 = vmul.f32 %v194_v14, %v185_v17 }
  0xeb   : > { %199 = vst [vmem:[%s172_s17] sm:$0xff] %v197_v18  ;;  %200 = vst [vmem:[%s172_s17 + $0x8] sm:$0xff] %v198_v19 }
  0xec   : > { %440 = shalt.err (!%p437_p3)
}
  0xed   : > { %s441_s26 = scalar_lea.hbm %s650_s19, 256  ;;  %s445_s3 = scalar_lea.hbm %s689_s2, 512 }
  0xee   : > { %p442_p12 = scmp.ne.s32.totalorder %s650_s19, %s441_s26  ;;  %p446_p6 = scmp.lt.s32.totalorder %s650_s19, %s689_s2 }
  0xef   : > { %p447_p4 = scmp.lt.s32.totalorder %s445_s3, %s441_s26 }
  0xf0   : > { %p443_p5 = pnand %p442_p12, %p706_p11 }
  0xf1   : > { %p448_p8 = por %p447_p4, %p446_p6 }
  0xf2   : > { %p444_p7 = pneg %p443_p5 }
  0xf4   : > { %p449_p9 = pnand %p448_p8, %p444_p7 }
  0xf6   : > { %452 = shalt.err (!%p449_p9)
}
  0xf7   : > { %320 = dma.vmem_to_hbm [thread:$0]  (%p706_p11), %s217_s7, 256, %s650_s19, %s202_s22  }
  0xf8 PF: > { %s228_s6 = sand.u32 1, %s483_s9   ;;  %p707_p13 = scmp.ne.s32.totalorder %s695_s16, 0 }
  0xf9   : > { %p708_p10 = scmp.ge.s32.totalorder %s495_s12, 2  ;;  %s229_s8 = scalar_lea.sflag [#allocation4], %s228_s6 }
  0xfb   : > { %p331_p1 = pnand %p708_p10, %p707_p13 }
  0xfd   : > { %p332_p2 = pneg %p331_p1 }
  0xff   : > { %478 = dma.done.wait (%p332_p2), %s229_s8, 256  }
 0x100   : > { %480 = vsyncadd (%p332_p2), %s229_s8, 4294967040  ;;  %p16_p0 = scmp.ge.s32.totalorder %s563_s20, 4   ;;  %s709_s9 = smov %s487_s10 }
 0x101   : > { %s710_s10 = smov %s491_s11  ;;  %s711_s11 = smov %s590_s28 }
 0x102   : > { %s712_s12 = smov %s563_s20  ;;  %18 = sbr.rel (!%p16_p0) target bundleno = 6 (0x6), region = 77 }
 0x107   :  { %234 = vsyncpa [#allocation3], 1 }
 0x108   :  { %236 = vsyncpa [#allocation3 + $0x1], 1 }
 0x109   :  { %237 = vsyncpa [#allocation6], 1 }
 0x10a   :  { %238 = vsyncpa [#allocation4], 1 }
 0x10b   :  { %240 = vsyncpa [#allocation4 + $0x1], 1 }

</bundles_post_ra>
